<compile_context>
chip_gen: v7x
topology: tpu7x:2x2x1
jax: 0.10.0
libtpu: 0.0.40
codegen_flags: <defaults>
</compile_context>

<pallas_src>
import functools

import jax
import jax.numpy as jnp
from jax.experimental import pallas as pl
from jax.experimental.pallas import tpu as pltpu

LANE = 128
SUBLANE = 8
DESIRED_BLOCK_ROWS = 4096   # 4096x128 f32 = 2 MiB/input block


def _num_tensorcores():
    """Best-effort TensorCores-per-chip; default to 1 (always safe/correct)."""
    try:
        kind = getattr(jax.devices()[0], "device_kind", "").lower()
        if any(t in kind for t in ("v5e", "v5 lite", "v5litepod", "v6e", "v6 lite", "trillium")):
            return 1
        if any(t in kind for t in ("v7", "v5p", "v4")):
            return 2
    except Exception:
        pass
    return 1


def _reg_loss_kernel(pred_ref, gt_ref, out_ref, *, eps, rows, block_rows,
                     acc_rows, blocks_per_core, num_blocks, need_mask,
                     approx_recip):
    c = pl.program_id(0)   # per-TensorCore (parallel) axis
    i = pl.program_id(1)   # streaming reduction axis

    @pl.when(i == 0)
    def _init():
        out_ref[...] = jnp.zeros_like(out_ref)

    p = pred_ref[...].astype(jnp.float32)
    g = gt_ref[...].astype(jnp.float32)

    # sigmoid(x) == 0.5*tanh(0.5*x) + 0.5 : single EUP push, no exp + divide.
    s = 0.5 * jnp.tanh(0.5 * p) + 0.5

    # smooth_l1_loss(s, g, reduction='none'), beta = 1.0
    diff = s - g
    adiff = jnp.abs(diff)
    loss_map = jnp.where(adiff < 1.0, 0.5 * diff * diff, adiff - 0.5)

    denom = g * g + eps
    if approx_recip:
        quotient = loss_map * pl.reciprocal(denom, approx=True)
    else:
        quotient = loss_map / denom
    # mask AFTER the divide via select (never multiply: 0 * NaN = NaN)
    w = jnp.where(g > 0.0, quotient, 0.0)

    def _accum(v):
        # elementwise vreg adds down to (acc_rows, LANE); no XLU reduce and no
        # sublane-masked accumulator traffic. Tiny final reduce in the wrapper.
        part = v.reshape(block_rows // acc_rows, acc_rows, LANE).sum(axis=0)
        out_ref[...] += part.reshape(1, acc_rows, LANE)

    if need_mask:
        # Only the last real block (possibly ragged) and clamped surplus blocks
        # pay the iota + compare + select; full blocks take the cheap path.
        global_block = c * blocks_per_core + i
        is_tail = global_block >= (num_blocks - 1)

        @pl.when(jnp.logical_not(is_tail))
        def _full():
            _accum(w)

        @pl.when(is_tail)
        def _tail():
            row_idx = (global_block * block_rows
                       + jax.lax.broadcasted_iota(jnp.int32, w.shape, 0))
            _accum(jnp.where(row_idx < rows, w, 0.0))
    else:
        _accum(w)


def _elementwise_weighted(p, g, eps):
    s = jax.nn.sigmoid(p)
    diff = s - g
    adiff = jnp.abs(diff)
    loss_map = jnp.where(adiff < 1.0, 0.5 * diff * diff, adiff - 0.5)
    return jnp.where(g > 0.0, loss_map / (g * g + eps), 0.0)


def regression_loss(pred, gt, *, loss_weight=1.0, epislon=1e-6,
                    use_approx_reciprocal=False):
    assert pred.shape == gt.shape, (
        f"pred {pred.shape} should has the same shape with gt {gt.shape}")
    n_elem = int(pred.size)
    if n_elem == 0:
        return jnp.float32(0.0)
    eps = float(epislon)

    flat_p = pred.reshape(-1)
    flat_g = gt.reshape(-1)

    rows = n_elem // LANE
    bulk = rows * LANE

    # Ragged tail (< 128 elements): tiny, handled with plain jnp (avoids padding
    # copies of the full inputs in HBM).
    if bulk < n_elem:
        tail_sum = jnp.sum(_elementwise_weighted(
            flat_p[bulk:].astype(jnp.float32),
            flat_g[bulk:].astype(jnp.float32), eps))
    else:
        tail_sum = jnp.float32(0.0)

    if rows == 0:
        total = tail_sum
    else:
        # Free reshape into a lane-dense (rows, 128) slab -- no padding, no cast.
        p2 = (flat_p[:bulk] if bulk < n_elem else flat_p).reshape(rows, LANE)
        g2 = (flat_g[:bulk] if bulk < n_elem else flat_g).reshape(rows, LANE)

        if rows >= SUBLANE:
            block_rows = min(DESIRED_BLOCK_ROWS, (rows // SUBLANE) * SUBLANE)
            acc_rows = SUBLANE
        else:
            block_rows = rows     # < 8 rows: block equals the full dim (allowed)
            acc_rows = rows
        num_blocks = pl.cdiv(rows, block_rows)

        ncores = _num_tensorcores()
        ncores = ncores if num_blocks >= ncores else 1
        blocks_per_core = pl.cdiv(num_blocks, ncores)
        need_mask = (ncores * blocks_per_core * block_rows) != rows

        def in_map(c, i):
            blk = c * blocks_per_core + i
            # Surplus blocks of the last core clamp into range for the DMA; the
            # in-kernel tail mask (unclamped global_block) zeroes their contribution.
            return (jnp.minimum(blk, num_blocks - 1), 0)

        kernel = functools.partial(
            _reg_loss_kernel, eps=eps, rows=rows, block_rows=block_rows,
            acc_rows=acc_rows, blocks_per_core=blocks_per_core,
            num_blocks=num_blocks, need_mask=need_mask,
            approx_recip=use_approx_reciprocal)

        in_bytes = p2.size * p2.dtype.itemsize + g2.size * g2.dtype.itemsize
        cost = pl.CostEstimate(flops=16 * bulk, transcendentals=2 * bulk,
                               bytes_accessed=in_bytes + ncores * acc_rows * LANE * 4)

        # TODO(synk): optionally sweep pipeline_mode=pl.Buffered(3) on the input specs.
        partials = pl.pallas_call(
            kernel,
            out_shape=jax.ShapeDtypeStruct((ncores, acc_rows, LANE), jnp.float32),
            grid_spec=pltpu.PrefetchScalarGridSpec(
                num_scalar_prefetch=0,
                grid=(ncores, blocks_per_core),
                in_specs=[pl.BlockSpec((block_rows, LANE), in_map),
                          pl.BlockSpec((block_rows, LANE), in_map)],
                out_specs=pl.BlockSpec((1, acc_rows, LANE), lambda c, i: (c, 0, 0)),
            ),
            compiler_params=pltpu.CompilerParams(
                dimension_semantics=("parallel", "arbitrary")),
            cost_estimate=cost,
        )(p2, g2)

        total = jnp.sum(partials) + tail_sum

    # mean over the ORIGINAL element count, scaled by loss_weight
    return total * jnp.float32(loss_weight / n_elem)


def _reference(pred, gt, loss_weight=1.0, epislon=1e-6):
    s = jax.nn.sigmoid(pred.astype(jnp.float32))
    g = gt.astype(jnp.float32)
    diff = s - g
    adiff = jnp.abs(diff)
    loss_map = jnp.where(adiff < 1.0, 0.5 * diff * diff, adiff - 0.5)
    weighted = loss_map / (g * g + epislon) * (g > 0.0).astype(jnp.float32)
    return loss_weight * jnp.mean(weighted)


if __name__ == "__main__":
    key = jax.random.PRNGKey(0)
    k1, k2, k3, k4 = jax.random.split(key, 4)

    # NCHW, like the PyTorch module's conv-style inputs
    pred = jax.random.normal(k1, (2, 4, 16, 16), dtype=jnp.float32)
    # gt: distances >= 0 (some exactly zero so the (gt > 0) mask matters)
    gt = jnp.maximum(jax.random.normal(k2, (2, 4, 16, 16), dtype=jnp.float32), 0.0)

    loss = jax.block_until_ready(regression_loss(pred, gt, loss_weight=1.0, epislon=1e-6))
    ref = _reference(pred, gt, loss_weight=1.0, epislon=1e-6)
    assert jnp.allclose(loss, ref, rtol=1e-4, atol=1e-6), (loss, ref)

    # Element count not a multiple of 128 -> exercises the ragged tail,
    # gated in-kernel row masking, and (on dual-TC chips) the core split.
    pred2 = jax.random.normal(k3, (3, 5, 30, 30), dtype=jnp.float32)
    gt2 = jnp.maximum(jax.random.normal(k4, (3, 5, 30, 30), dtype=jnp.float32), 0.0)
    loss2 = jax.block_until_ready(regression_loss(pred2, gt2, loss_weight=2.0, epislon=1e-6))
    ref2 = _reference(pred2, gt2, loss_weight=2.0, epislon=1e-6)
    assert jnp.allclose(loss2, ref2, rtol=1e-4, atol=1e-6), (loss2, ref2)

    print("KERNEL_OK")
</pallas_src>

<mosaic_0001>
module attributes {stable_mosaic.version = 11 : i64} {
  func.func @_reg_loss_kernel(%arg0: i32, %arg1: i32, %arg2: memref<16x128xf32, #tpu.memory_space<vmem>>, %arg3: memref<16x128xf32, #tpu.memory_space<vmem>>, %arg4: memref<1x8x128xf32, #tpu.memory_space<vmem>>) attributes {dimension_semantics = [#tpu.dimension_semantics<parallel>, #tpu.dimension_semantics<arbitrary>], iteration_bounds = array<i64: 1, 1>, scalar_prefetch = 0 : i64, scratch_operands = 0 : i64, tpu.core_type = #tpu.core_type<tc>, window_params = [{transform_indices = @transform_0, window_bounds = array<i64: 16, 128>}, {transform_indices = @transform_1, window_bounds = array<i64: 16, 128>}, {transform_indices = @transform_2, window_bounds = array<i64: 1, 8, 128>}]} {
    %c0_i32 = arith.constant 0 : i32
    %0 = arith.cmpi eq, %arg1, %c0_i32 : i32
    %1 = arith.extui %0 : i1 to i32
    %c0_i32_0 = arith.constant 0 : i32
    %2 = arith.cmpi ne, %1, %c0_i32_0 : i32
    scf.if %2 {
      %cst_19 = arith.constant 0.000000e+00 : f32
      %36 = vector.broadcast %cst_19 : f32 to vector<1x8x128xf32>
      %c0_20 = arith.constant 0 : index
      %c0_21 = arith.constant 0 : index
      %c0_22 = arith.constant 0 : index
      %37 = vector.load %arg4[%c0_20, %c0_21, %c0_22] : memref<1x8x128xf32, #tpu.memory_space<vmem>>, vector<1x8x128xf32>
      tpu.vector_store %arg4[%c0_20, %c0_21, %c0_22], %36 {strides = array<i32>} : memref<1x8x128xf32, #tpu.memory_space<vmem>>, vector<1x8x128xf32>,
    } else {
    }
    %c0 = arith.constant 0 : index
    %c0_1 = arith.constant 0 : index
    %3 = vector.load %arg2[%c0, %c0_1] : memref<16x128xf32, #tpu.memory_space<vmem>>, vector<16x128xf32>
    %c0_2 = arith.constant 0 : index
    %c0_3 = arith.constant 0 : index
    %4 = vector.load %arg3[%c0_2, %c0_3] : memref<16x128xf32, #tpu.memory_space<vmem>>, vector<16x128xf32>
    %cst = arith.constant 5.000000e-01 : f32
    %5 = vector.broadcast %cst : f32 to vector<16x128xf32>
    %6 = arith.mulf %5, %3 : vector<16x128xf32>
    %7 = math.tanh %6 : vector<16x128xf32>
    %cst_4 = arith.constant 5.000000e-01 : f32
    %8 = vector.broadcast %cst_4 : f32 to vector<16x128xf32>
    %9 = arith.mulf %8, %7 : vector<16x128xf32>
    %cst_5 = arith.constant 5.000000e-01 : f32
    %10 = vector.broadcast %cst_5 : f32 to vector<16x128xf32>
    %11 = arith.addf %9, %10 : vector<16x128xf32>
    %12 = arith.subf %11, %4 : vector<16x128xf32>
    %13 = math.absf %12 : vector<16x128xf32>
    %cst_6 = arith.constant 1.000000e+00 : f32
    %14 = vector.broadcast %cst_6 : f32 to vector<16x128xf32>
    %15 = arith.cmpf olt, %13, %14 : vector<16x128xf32>
    %cst_7 = arith.constant 5.000000e-01 : f32
    %16 = vector.broadcast %cst_7 : f32 to vector<16x128xf32>
    %17 = arith.mulf %16, %12 : vector<16x128xf32>
    %18 = arith.mulf %17, %12 : vector<16x128xf32>
    %cst_8 = arith.constant 5.000000e-01 : f32
    %19 = vector.broadcast %cst_8 : f32 to vector<16x128xf32>
    %20 = arith.subf %13, %19 : vector<16x128xf32>
    %21 = arith.select %15, %18, %20 : vector<16x128xi1>, vector<16x128xf32>
    %22 = arith.mulf %4, %4 : vector<16x128xf32>
    %cst_9 = arith.constant 9.99999997E-7 : f32
    %23 = vector.broadcast %cst_9 : f32 to vector<16x128xf32>
    %24 = arith.addf %22, %23 : vector<16x128xf32>
    %25 = arith.divf %21, %24 : vector<16x128xf32>
    %cst_10 = arith.constant 0.000000e+00 : f32
    %26 = vector.broadcast %cst_10 : f32 to vector<16x128xf32>
    %27 = arith.cmpf ogt, %4, %26 : vector<16x128xf32>
    %cst_11 = arith.constant 0.000000e+00 : f32
    %28 = vector.broadcast %cst_11 : f32 to vector<16x128xf32>
    %29 = arith.select %27, %25, %28 : vector<16x128xi1>, vector<16x128xf32>
    %30 = vector.shape_cast %29 : vector<16x128xf32> to vector<2x8x128xf32>
    %cst_12 = arith.constant dense<0.000000e+00> : vector<8x128xf32>
    %31 = vector.multi_reduction <add>, %30, %cst_12 [0] : vector<2x8x128xf32> to vector<8x128xf32>
    %c0_13 = arith.constant 0 : index
    %c0_14 = arith.constant 0 : index
    %c0_15 = arith.constant 0 : index
    %32 = vector.load %arg4[%c0_13, %c0_14, %c0_15] : memref<1x8x128xf32, #tpu.memory_space<vmem>>, vector<1x8x128xf32>
    %33 = vector.shape_cast %31 : vector<8x128xf32> to vector<1x8x128xf32>
    %34 = arith.addf %32, %33 : vector<1x8x128xf32>
    %c0_16 = arith.constant 0 : index
    %c0_17 = arith.constant 0 : index
    %c0_18 = arith.constant 0 : index
    %35 = vector.load %arg4[%c0_16, %c0_17, %c0_18] : memref<1x8x128xf32, #tpu.memory_space<vmem>>, vector<1x8x128xf32>
    tpu.vector_store %arg4[%c0_16, %c0_17, %c0_18], %34 {strides = array<i32>} : memref<1x8x128xf32, #tpu.memory_space<vmem>>, vector<1x8x128xf32>,
    return
  }
  func.func @transform_0(%arg0: i32, %arg1: i32) -> (i32, i32) {
    %c1_i32 = arith.constant 1 : i32
    %0 = arith.muli %arg0, %c1_i32 : i32
    %1 = arith.addi %0, %arg1 : i32
    %c0_i32 = arith.constant 0 : i32
    %2 = arith.minsi %1, %c0_i32 : i32
    %c0_i32_0 = arith.constant 0 : i32
    %c0_i32_1 = arith.constant 0 : i32
    return %2, %c0_i32_0 : i32, i32
  }
  func.func @transform_1(%arg0: i32, %arg1: i32) -> (i32, i32) {
    %c1_i32 = arith.constant 1 : i32
    %0 = arith.muli %arg0, %c1_i32 : i32
    %1 = arith.addi %0, %arg1 : i32
    %c0_i32 = arith.constant 0 : i32
    %2 = arith.minsi %1, %c0_i32 : i32
    %c0_i32_0 = arith.constant 0 : i32
    %c0_i32_1 = arith.constant 0 : i32
    return %2, %c0_i32_0 : i32, i32
  }
  func.func @transform_2(%arg0: i32, %arg1: i32) -> (i32, i32, i32) {
    %c0_i32 = arith.constant 0 : i32
    %c0_i32_0 = arith.constant 0 : i32
    %c0_i32_1 = arith.constant 0 : i32
    return %arg0, %c0_i32, %c0_i32_0 : i32, i32, i32
  }
}

</mosaic_0001>

<bundles_post_ra>
// kernel: tpu_custom_call.1
= control target key start
LH: loop header
LB: loop body
LE: loop exit
PB: predicated region body
PF: predicated region fallthrough
CT: control target
= control target key end

     0   :  { %7 = vsyncpa [#allocation3], 0  ;;  %s271_s0 = inlined_call_operand.hbm [shape: f32[16,128], index: 0, kind: input, shape index: {}]   ;;  %s272_s1 = inlined_call_operand.hbm [shape: f32[16,128], index: 1, kind: input, shape index: {}]   ;;  %s273_s2 = inlined_call_operand.hbm [shape: f32[1,8,128], index: 2, kind: output, shape index: {}]  }
   0x1   :  { %8 = vsyncpa [#allocation6], 0 }
   0x2   :  { %9 = vsyncpa [#allocation4], 0  ;;  %s215_s9 = smov [#allocation2]   ;;  %s143_s13 = scalar_lea.hbm %s271_s0, 256 }
   0x3   :  { %s21_s10 = sshll.u32 %s215_s9, 4  ;;  %p144_p0 = scmp.ne.s32.totalorder %s271_s0, %s143_s13  ;;  %s22_s10 = int_to_ptr.vmem [resolvable:$true] %s21_s10 }
   0x4   :  { %p147_p1 = scmp.lt.u32.totalorder %s143_s13, %s271_s0 }
   0x6   :  { %p149_p2 = pnand %p147_p1, %p144_p0 }
   0x8   :  { %152 = shalt.err (!%p149_p2)
}
   0x9   :  { %s153_s18 = scalar_lea.vmem %s22_s10, 256  ;;  %p158_p4 = scmp.lt.s32.totalorder %s22_s10, %s22_s10 }
   0xa   :  { %p154_p3 = scmp.ne.s32.totalorder %s22_s10, %s153_s18  ;;  %p159_p5 = scmp.lt.s32.totalorder %s153_s18, %s153_s18 }
   0xc   :  { %p160_p6 = por %p159_p5, %p158_p4 }
   0xe   :  { %p161_p7 = pnand %p160_p6, %p154_p3 }
  0x10   :  { %164 = shalt.err (!%p161_p7)
}
  0x11   :  { %s216_s19 = smov 128   ;;  %s217_s20 = smov 8  }
  0x12   :  { %27 = dma.hbm_to_vmem [thread:$0]  %s271_s0, 256, %s22_s10, [#allocation3], %s216_s19, %s216_s19, %s217_s20  }
  0x13   :  { %s218_s23 = smov [#allocation5]   ;;  %s165_s27 = scalar_lea.hbm %s272_s1, 256 }
  0x14   :  { %s39_s24 = sshll.u32 %s218_s23, 4  ;;  %p166_p8 = scmp.ne.s32.totalorder %s272_s1, %s165_s27  ;;  %s40_s24 = int_to_ptr.vmem [resolvable:$true] %s39_s24 }
  0x15   :  { %p169_p9 = scmp.lt.u32.totalorder %s165_s27, %s272_s1 }
  0x17   :  { %p171_p10 = pnand %p169_p9, %p166_p8 }
  0x19   :  { %174 = shalt.err (!%p171_p10)
}
  0x1a   :  { %s175_s4 = scalar_lea.vmem %s40_s24, 256  ;;  %p180_p12 = scmp.lt.s32.totalorder %s40_s24, %s40_s24 }
  0x1b   :  { %p176_p11 = scmp.ne.s32.totalorder %s40_s24, %s175_s4  ;;  %p181_p13 = scmp.lt.s32.totalorder %s175_s4, %s175_s4 }
  0x1d   :  { %p182_p0 = por %p181_p13, %p180_p12 }
  0x1f   :  { %p183_p1 = pnand %p182_p0, %p176_p11 }
  0x21   :  { %186 = shalt.err (!%p183_p1)
}
  0x22   :  { %45 = dma.hbm_to_vmem [thread:$0]  %s272_s1, 256, %s40_s24, [#allocation6], %s216_s19, %s216_s19, %s217_s20  }
  0x23   :  { %209 = dma.done.wait [#allocation3], 256  }
  0x24   :  { %210 = vsyncadd [#allocation3], 4294967040 }
  0x25   :  { %211 = dma.done.wait [#allocation6], 256  }
  0x26   :  { %212 = vsyncadd [#allocation6], 4294967040  ;;  %v65_v0 = vld [vmem:[#allocation2] sm:$0xff]  ;;  %v66_v1 = vld [vmem:[#allocation2 + $0x8] sm:$0xff]  ;;  %s219_s1 = smov [#allocation7]  }
  0x27   :  { %v67_v2 = vld [vmem:[#allocation5] sm:$0xff]  ;;  %v69_v3 = vmul.f32 0.5, %v65_v0  ;;  %v70_v4 = vmul.f32 0.5, %v66_v1  ;;  %v68_v5 = vld [vmem:[#allocation5 + $0x8] sm:$0xff]  ;;  %s113_s6 = sshll.u32 %s219_s1, 4  ;;  %s114_s6 = int_to_ptr.vmem [resolvable:$true] %s113_s6 }
  0x28   :  { %v91_v6 = vmul.f32 %v67_v2, %v67_v2  ;;  %v92_v7 = vmul.f32 %v68_v5, %v68_v5  ;;  %vm99_vm2 = vcmp.gt.f32.partialorder %v67_v2, 0.0  ;;  %vm100_vm3 = vcmp.gt.f32.partialorder %v68_v5, 0.0  ;;  %s187_s7 = scalar_lea.vmem %s114_s6, 128  ;;  %p192_p3 = scmp.lt.s32.totalorder %s114_s6, %s114_s6 }
  0x29   :  { %135 = vtanh.f32 %v69_v3  ;;  %p188_p2 = scmp.ne.s32.totalorder %s114_s6, %s187_s7  ;;  %p193_p4 = scmp.lt.s32.totalorder %s187_s7, %s187_s7 }
  0x2a   :  { %137 = vtanh.f32 %v70_v4  ;;  %v93_v8 = vadd.f32 1e-06, %v91_v6  ;;  %v94_v9 = vadd.f32 1e-06, %v92_v7 }
  0x2b   :  { %p194_p5 = por %p193_p4, %p192_p3 }
  0x2c   :  { %139 = vrcp.f32 %v93_v8 }
  0x2d   :  { %141 = vrcp.f32 %v94_v9  ;;  %p195_p6 = pnand %p194_p5, %p188_p2 }
  0x33   :  { %v136_v10 = vpop.eup %135 }
  0x34   :  { %v138_v11 = vpop.eup %137  ;;  %v73_v12 = vmul.f32 0.5, %v136_v10 }
  0x35   :  { %v74_v13 = vmul.f32 0.5, %v138_v11 }
  0x36   :  { %v75_v14 = vadd.f32 0.5, %v73_v12  ;;  %v140_v22 = vpop.eup %139 }
  0x37   :  { %v76_v15 = vadd.f32 0.5, %v74_v13  ;;  %v142_v25 = vpop.eup %141 }
  0x38   :  { %v77_v16 = vsub.f32 %v75_v14, %v67_v2 }
  0x39   :  { %v78_v17 = vsub.f32 %v76_v15, %v68_v5 }
  0x3a   :  { %v79_v18 = vand.u32 2147483647, %v77_v16  ;;  %v83_v19 = vmul.f32 0.5, %v77_v16 }
  0x3b   :  { %v80_v20 = vand.u32 2147483647, %v78_v17  ;;  %v84_v21 = vmul.f32 0.5, %v78_v17 }
  0x3c   :  { %vm81_vm0 = vcmp.lt.f32.partialorder %v79_v18, 1.0  ;;  %v85_v23 = vmul.f32 %v83_v19, %v77_v16  ;;  %v127_v24 = vadd.f32 -0.5, %v79_v18 }
  0x3d   :  { %vm82_vm1 = vcmp.lt.f32.partialorder %v80_v20, 1.0  ;;  %v86_v26 = vmul.f32 %v84_v21, %v78_v17  ;;  %v128_v27 = vadd.f32 -0.5, %v80_v20 }
  0x3e   :  { %v89_v28 = vsel %vm81_vm0, %v85_v23, %v127_v24 }
  0x3f   :  { %v90_v29 = vsel %vm82_vm1, %v86_v26, %v128_v27  ;;  %v96_v30 = vmul.f32 %v140_v22, %v89_v28 }
  0x40   :  { %v98_v31 = vmul.f32 %v142_v25, %v90_v29 }
  0x41   :  { %v101_v32 = vsel %vm99_vm2, %v96_v30, 0.0 }
  0x42   :  { %v102_v33 = vsel %vm100_vm3, %v98_v31, 0.0 }
  0x43   :  { %v103_v34 = vadd.f32 %v102_v33, %v101_v32 }
  0x45   :  { %106 = vst [vmem:[#allocation7] sm:$0xff] %v103_v34 }
  0x46   :  { %198 = shalt.err (!%p195_p6)
}
  0x47   :  { %s199_s10 = scalar_lea.hbm %s273_s2, 128 }
  0x48   :  { %p200_p7 = scmp.ne.s32.totalorder %s273_s2, %s199_s10  ;;  %p203_p8 = scmp.lt.u32.totalorder %s199_s10, %s273_s2 }
  0x4a   :  { %p205_p9 = pnand %p203_p8, %p200_p7 }
  0x4c   :  { %208 = shalt.err (!%p205_p9)
}
  0x4d   :  { %116 = dma.vmem_to_hbm [thread:$0]  %s114_s6, 128, %s273_s2, [#allocation4]  }
  0x4e   :  { %213 = dma.done.wait [#allocation4], 128  }
  0x4f   :  { %214 = vsyncadd [#allocation4], 4294967168 }
  0x50   :  { %120 = vsyncpa [#allocation3], 1 }
  0x51   :  { %121 = vsyncpa [#allocation6], 1 }
  0x52   :  { %122 = vsyncpa [#allocation4], 1 }

</bundles_post_ra>
